<compile_context>
chip_gen: v7x
topology: tpu7x:2x2x1
jax: 0.10.0
libtpu: 0.0.40
codegen_flags: <defaults>
</compile_context>

<pallas_src>
import jax
import jax.numpy as jnp
from jax.experimental import pallas as pl
from jax.experimental.pallas import tpu as pltpu


def _inv_affine_kernel(x_ref, loc_ref, inv_scale_ref, o_ref):
    # x_ref / o_ref: (R_BLOCK, L_BLOCK) VMEM tiles of the flattened
    # (N*C, H*W) slab.  loc_ref / inv_scale_ref: (R_BLOCK, 1) per-row column
    # vectors, broadcast across lanes by the VPU for free.
    x = x_ref[...]
    o_ref[...] = ((x - loc_ref[...]) * inv_scale_ref[...]).astype(o_ref.dtype)


def inv_affine(
    x: jax.Array,
    loc: jax.Array,
    scale: jax.Array,
    *,
    target_tile_bytes: int = 2 * 1024 * 1024,
) -> jax.Array:
    """(x - loc) / scale with per-channel loc/scale, x in NCHW."""
    N, C, H, W = x.shape
    assert loc.shape == (C,) and scale.shape == (C,)

    R = N * C          # rows of the flattened slab (one row per (n, c) plane)
    L = H * W          # lane dimension: the full image plane

    # Flatten to a lane-dense 2D slab.
    x2 = x.reshape(R, L)

    # Per-row loc and 1/scale column vectors (f32 params, trivial size).
    loc_f32 = loc.astype(jnp.float32)
    inv_scale_f32 = 1.0 / scale.astype(jnp.float32)
    loc_col = jnp.broadcast_to(loc_f32[None, :], (N, C)).reshape(R, 1)
    inv_scale_col = jnp.broadcast_to(inv_scale_f32[None, :], (N, C)).reshape(R, 1)

    # Tile sizing.  Sublane packing factor: 8 for f32, 16 for bf16, 32 for i8.
    itemsize = jnp.dtype(x.dtype).itemsize
    sublane_mult = max(8, 32 // itemsize)
    row_bytes = L * itemsize

    if R * row_bytes <= target_tile_bytes:
        # Whole slab fits comfortably in a single tile: one grid step.
        r_block, l_block = R, L
    elif row_bytes * sublane_mult <= target_tile_bytes:
        # Tile rows only; each tile keeps the full lane-dense plane width.
        r_block = (target_tile_bytes // row_bytes) // sublane_mult * sublane_mult
        r_block = max(sublane_mult, min(r_block, R))
        l_block = L
    else:
        # Even a minimal row-block exceeds the budget: tile lanes too,
        # in multiples of 128 to keep unmasked full-width vector stores.
        r_block = sublane_mult
        l_block = (target_tile_bytes // (r_block * itemsize)) // 128 * 128
        l_block = max(128, min(l_block, L))

    grid = (pl.cdiv(R, r_block), pl.cdiv(L, l_block))

    out2 = pl.pallas_call(
        _inv_affine_kernel,
        out_shape=jax.ShapeDtypeStruct((R, L), x.dtype),
        grid_spec=pl.GridSpec(
            grid=grid,
            in_specs=[
                pl.BlockSpec((r_block, l_block), lambda i, j: (i, j)),
                pl.BlockSpec((r_block, 1), lambda i, j: (i, 0)),
                pl.BlockSpec((r_block, 1), lambda i, j: (i, 0)),
            ],
            out_specs=pl.BlockSpec((r_block, l_block), lambda i, j: (i, j)),
        ),
        compiler_params=pltpu.CompilerParams(
            dimension_semantics=("parallel", "parallel"),
        ),
    )(x2, loc_col, inv_scale_col)

    return out2.reshape(N, C, H, W)


if __name__ == "__main__":
    key = jax.random.PRNGKey(0)
    kx, kl, ks = jax.random.split(key, 3)

    N, C, H, W = 2, 4, 16, 16
    x = jax.random.normal(kx, (N, C, H, W), dtype=jnp.float32)

    # Deterministic per-channel "ImageNet-style" loc / scale parameters.
    loc = jax.random.normal(kl, (C,), dtype=jnp.float32) * 0.5
    scale = jnp.abs(jax.random.normal(ks, (C,), dtype=jnp.float32)) + 0.5

    out = inv_affine(x, loc, scale)
    jax.block_until_ready(out)

    # Reference check against plain-JAX broadcast semantics (matches PyTorch).
    ref = (x - loc[None, :, None, None]) / scale[None, :, None, None]
    assert out.shape == ref.shape and out.dtype == ref.dtype
    assert jnp.allclose(out, ref, atol=1e-5, rtol=1e-5)

    print("KERNEL_OK")
</pallas_src>

<mosaic_0001>
module attributes {stable_mosaic.version = 11 : i64} {
  func.func @_inv_affine_kernel(%arg0: i32, %arg1: i32, %arg2: memref<8x256xf32, #tpu.memory_space<vmem>>, %arg3: memref<8x1xf32, #tpu.memory_space<vmem>>, %arg4: memref<8x1xf32, #tpu.memory_space<vmem>>, %arg5: memref<8x256xf32, #tpu.memory_space<vmem>>) attributes {dimension_semantics = [#tpu.dimension_semantics<parallel>, #tpu.dimension_semantics<parallel>], iteration_bounds = array<i64: 1, 1>, scalar_prefetch = 0 : i64, scratch_operands = 0 : i64, tpu.core_type = #tpu.core_type<tc>, window_params = [{transform_indices = @transform_0, window_bounds = array<i64: 8, 256>}, {transform_indices = @transform_1, window_bounds = array<i64: 8, 1>}, {transform_indices = @transform_2, window_bounds = array<i64: 8, 1>}, {transform_indices = @transform_3, window_bounds = array<i64: 8, 256>}]} {
    %c0 = arith.constant 0 : index
    %c0_0 = arith.constant 0 : index
    %0 = vector.load %arg2[%c0, %c0_0] : memref<8x256xf32, #tpu.memory_space<vmem>>, vector<8x256xf32>
    %c0_1 = arith.constant 0 : index
    %c0_2 = arith.constant 0 : index
    %1 = vector.load %arg3[%c0_1, %c0_2] : memref<8x1xf32, #tpu.memory_space<vmem>>, vector<8x1xf32>
    %2 = vector.broadcast %1 : vector<8x1xf32> to vector<8x256xf32>
    %3 = arith.subf %0, %2 : vector<8x256xf32>
    %c0_3 = arith.constant 0 : index
    %c0_4 = arith.constant 0 : index
    %4 = vector.load %arg4[%c0_3, %c0_4] : memref<8x1xf32, #tpu.memory_space<vmem>>, vector<8x1xf32>
    %5 = vector.broadcast %4 : vector<8x1xf32> to vector<8x256xf32>
    %6 = arith.mulf %3, %5 : vector<8x256xf32>
    %c0_5 = arith.constant 0 : index
    %c0_6 = arith.constant 0 : index
    %7 = vector.load %arg5[%c0_5, %c0_6] : memref<8x256xf32, #tpu.memory_space<vmem>>, vector<8x256xf32>
    tpu.vector_store %arg5[%c0_5, %c0_6], %6 {strides = array<i32>} : memref<8x256xf32, #tpu.memory_space<vmem>>, vector<8x256xf32>,
    return
  }
  func.func @transform_0(%arg0: i32, %arg1: i32) -> (i32, i32) {
    %c0_i32 = arith.constant 0 : i32
    return %arg0, %arg1 : i32, i32
  }
  func.func @transform_1(%arg0: i32, %arg1: i32) -> (i32, i32) {
    %c0_i32 = arith.constant 0 : i32
    %c0_i32_0 = arith.constant 0 : i32
    return %arg0, %c0_i32 : i32, i32
  }
  func.func @transform_2(%arg0: i32, %arg1: i32) -> (i32, i32) {
    %c0_i32 = arith.constant 0 : i32
    %c0_i32_0 = arith.constant 0 : i32
    return %arg0, %c0_i32 : i32, i32
  }
  func.func @transform_3(%arg0: i32, %arg1: i32) -> (i32, i32) {
    %c0_i32 = arith.constant 0 : i32
    return %arg0, %arg1 : i32, i32
  }
}

</mosaic_0001>

<bundles_post_ra>
// kernel: tpu_custom_call.1
= control target key start
LH: loop header
LB: loop body
LE: loop exit
PB: predicated region body
PF: predicated region fallthrough
CT: control target
= control target key end

     0   :  { %s122_s0 = inlined_call_operand.vmem [shape: f32[8,256], index: 0, kind: input, shape index: {}]   ;;  %s123_s1 = inlined_call_operand.vmem [shape: f32[8,1], index: 1, kind: input, shape index: {}]   ;;  %s124_s2 = inlined_call_operand.vmem [shape: f32[8,1], index: 2, kind: input, shape index: {}]   ;;  %s125_s3 = inlined_call_operand.hbm [shape: f32[8,256], index: 3, kind: output, shape index: {}]  }
   0x1   :  { %v17_v0 = vld [vmem:[%s123_s1] sm:$0xff] }
   0x2   :  { %8 = vsyncpa [#allocation3], 0  ;;  %v76_v1 = vmov 0   ;;  %v25_v2 = vld [vmem:[%s124_s2] sm:$0xff]  ;;  %v16_v5 = vld [vmem:[%s122_s0 + $0x8] sm:$0xff]  ;;  %s77_s20 = smov [#allocation2]  }
   0x3   :  { %51 = vset.pattern.permute.xlu0 %v76_v1  ;;  %v15_v4 = vld [vmem:[%s122_s0] sm:$0xff]  ;;  %s41_s1 = sshll.u32 %s77_s20, 4  ;;  %s42_s1 = int_to_ptr.vmem [resolvable:$true] %s41_s1 }
   0x4   :  { %20 = vperm.xlu0 %51, %v17_v0   ;;  %s52_s2 = scalar_lea.vmem %s42_s1, 256  ;;  %p57_p1 = scmp.lt.s32.totalorder %s42_s1, %s42_s1 }
   0x5   :  { %p53_p0 = scmp.ne.s32.totalorder %s42_s1, %s52_s2  ;;  %p58_p2 = scmp.lt.s32.totalorder %s52_s2, %s52_s2 }
   0x7   :  { %p59_p3 = por %p58_p2, %p57_p1 }
   0x8   :  { %28 = vperm.xlu0 %51, %v25_v2  }
   0x9   :  { %p60_p4 = pnand %p59_p3, %p53_p0 }
  0x83   :  { %v21_v3 = vpop.permute.xlu0 %20 }
  0x84   :  { %v23_v6 = vsub.f32 %v15_v4, %v21_v3  ;;  %v24_v7 = vsub.f32 %v16_v5, %v21_v3 }
  0x87   :  { %v29_v8 = vpop.permute.xlu0 %28 }
  0x88   :  { %v31_v9 = vmul.f32 %v29_v8, %v23_v6  ;;  %v32_v10 = vmul.f32 %v29_v8, %v24_v7 }
  0x8a   :  { %33 = vst [vmem:[#allocation2] sm:$0xff] %v31_v9  ;;  %34 = vst [vmem:[#allocation2 + $0x8] sm:$0xff] %v32_v10 }
  0x8b   :  { %63 = shalt.err (!%p60_p4)
}
  0x8c   :  { %s64_s0 = scalar_lea.hbm %s125_s3, 256 }
  0x8d   :  { %p65_p5 = scmp.ne.s32.totalorder %s125_s3, %s64_s0  ;;  %p68_p6 = scmp.lt.u32.totalorder %s64_s0, %s125_s3 }
  0x8f   :  { %p70_p7 = pnand %p68_p6, %p65_p5 }
  0x91   :  { %73 = shalt.err (!%p70_p7)
}
  0x92   :  { %44 = dma.vmem_to_hbm [thread:$0]  %s42_s1, 256, %s125_s3, [#allocation3]  }
  0x93   :  { %74 = dma.done.wait [#allocation3], 256  }
  0x94   :  { %75 = vsyncadd [#allocation3], 4294967040 }
  0x95   :  { %48 = vsyncpa [#allocation3], 1 }

</bundles_post_ra>
